<compile_context>
chip_gen: v6e
topology: v6e:2x2x1
jax: 0.10.0
libtpu: 0.0.40
codegen_flags: <defaults>
</compile_context>

<pallas_src>
import functools

import jax
import jax.numpy as jnp
from jax.experimental import pallas as pl
from jax.experimental.pallas import tpu as pltpu

_MIB = 1024 * 1024


# ----------------------------------------------------------------------------
# Fast path: whole (C, HW) image slab per block, batch-tiled grid.
# ----------------------------------------------------------------------------
def _se_fused_kernel(x_ref, w1t_ref, w2t_ref, o_ref):
    # x_ref/o_ref: (bt, C, HW)   w1t_ref: (C, hidden) f32   w2t_ref: (hidden, C) f32
    # Squeeze: global average pool over spatial (lane axis), f32 accumulation.
    y = jnp.mean(x_ref[...], axis=-1, dtype=jnp.float32)          # (bt, C)

    # Excite: two bias-free linears (tiny, fully hidden under the HBM stream).
    h = jnp.maximum(
        jnp.dot(y, w1t_ref[...], preferred_element_type=jnp.float32), 0.0)
    s = jax.nn.sigmoid(
        jnp.dot(h, w2t_ref[...], preferred_element_type=jnp.float32))  # (bt, C)

    # Scale: re-read x (VMEM stream) and broadcast the gate along lanes.
    o_ref[...] = x_ref[...] * s.astype(o_ref.dtype)[:, :, None]


# ----------------------------------------------------------------------------
# Fallback path (huge images): HW-tiled pool+excite, then HW-tiled scale.
# ----------------------------------------------------------------------------
def _make_pool_excite_kernel(HW, hw_t):
    def kernel(x_ref, w1t_ref, w2t_ref, gate_ref, acc_ref):
        # x_ref: (B, C, hw_t)   gate_ref: (B, C, 1) f32   acc_ref: (B, C) f32
        hw = pl.program_id(0)

        @pl.when(hw == 0)
        def _():
            acc_ref[...] = jnp.zeros_like(acc_ref)

        if HW % hw_t == 0:
            xm = x_ref[...]
        else:
            # Mask the out-of-range lanes of the ragged final spatial tile.
            lane = jax.lax.broadcasted_iota(jnp.int32, x_ref.shape, dimension=2)
            xm = jnp.where(lane < (HW - hw * hw_t), x_ref[...],
                           jnp.zeros((), x_ref.dtype))
        acc_ref[...] += jnp.sum(xm, axis=-1, dtype=jnp.float32)

        @pl.when(hw == pl.num_programs(0) - 1)
        def _():
            y = acc_ref[...] * jnp.float32(1.0 / HW)               # (B, C)
            h = jnp.maximum(
                jnp.dot(y, w1t_ref[...], preferred_element_type=jnp.float32), 0.0)
            s = jax.nn.sigmoid(
                jnp.dot(h, w2t_ref[...], preferred_element_type=jnp.float32))
            gate_ref[...] = s[:, :, None]

    return kernel


def _se_scale_kernel(x_ref, g_ref, o_ref):
    # x_ref/o_ref: (1, C, hw_t)   g_ref: (1, C, 1) f32
    o_ref[...] = x_ref[...] * g_ref[...].astype(o_ref.dtype)


# ----------------------------------------------------------------------------
# Tiling heuristics.
# ----------------------------------------------------------------------------
def _vmem_budgets():
    try:
        vmem_phys = int(pltpu.get_tpu_info().vmem_capacity_bytes)
    except Exception:
        vmem_phys = 64 * _MIB            # conservative (v7x-sized) fallback
    vmem_limit = int(min(max(vmem_phys - 16 * _MIB, 32 * _MIB), 100 * _MIB))
    if vmem_phys > 96 * _MIB:            # 128 MiB parts (v5e/v6e): relax budget
        block_budget = (vmem_limit * 3) // 4
    else:                                # 64 MiB parts (v7x): stay conservative
        block_budget = vmem_limit // 2
    return vmem_limit, block_budget


def _pick_batch_tile(B, per_image_bytes, block_budget_bytes):
    # in + out blocks, double-buffered -> 4 resident copies per grid step.
    bt_budget = max(1, block_budget_bytes // (4 * per_image_bytes))
    bt = bt_budget
    if B >= 4:
        step_cap = max(1, B // 4)                     # >=4 grid steps (2 per v7x core)
        floor_bt = -(-2 * _MIB // per_image_bytes)    # but keep blocks >= ~2 MiB
        bt = min(bt_budget, max(step_cap, floor_bt))
    return max(1, min(bt, B))


def _pick_hw_tile(HW, per_col_bytes, block_budget_bytes):
    hw_t = block_budget_bytes // (4 * per_col_bytes)
    hw_t = max(128, (hw_t // 128) * 128)              # lane-aligned spatial tiles
    return HW if hw_t >= HW else hw_t


# ----------------------------------------------------------------------------
# Wrapper.
# ----------------------------------------------------------------------------
@functools.partial(jax.jit, static_argnames=("max_block_bytes",))
def se_layer(x, w1, w2, *, max_block_bytes=None):
    """x: (B, C, H, W); w1: (C//r, C); w2: (C, C//r) (PyTorch Linear layout)."""
    B, C, H, W = x.shape
    hidden = w1.shape[0]
    HW = H * W
    elt = jnp.dtype(x.dtype).itemsize

    # Zero-copy reshape to (B, C, HW); HW lands on the lane axis in-kernel.
    x3 = x.reshape(B, C, HW)
    # Pre-transpose + pre-cast weights (grid-invariant, a few KiB in f32).
    w1_t = jnp.transpose(w1).astype(jnp.float32)      # (C, hidden)
    w2_t = jnp.transpose(w2).astype(jnp.float32)      # (hidden, C)

    vmem_limit, block_budget = _vmem_budgets()
    if max_block_bytes is not None:
        block_budget = int(max_block_bytes)

    per_image_bytes = C * HW * elt
    compiler_params = pltpu.CompilerParams(
        dimension_semantics=("parallel",),
        vmem_limit_bytes=vmem_limit,
    )

    if 4 * per_image_bytes <= block_budget:
        # ---------------- fast path: fused squeeze/excite/scale ----------------
        bt = _pick_batch_tile(B, per_image_bytes, block_budget)
        cost = pl.CostEstimate(
            flops=3 * B * C * HW + 4 * B * C * hidden,
            transcendentals=B * C,
            bytes_accessed=2 * B * C * HW * elt + 2 * C * hidden * 4,
        )
        out3 = pl.pallas_call(
            _se_fused_kernel,
            out_shape=jax.ShapeDtypeStruct((B, C, HW), x.dtype),
            grid_spec=pltpu.PrefetchScalarGridSpec(
                num_scalar_prefetch=0,
                grid=(pl.cdiv(B, bt),),
                in_specs=[
                    pl.BlockSpec((bt, C, HW), lambda b: (b, 0, 0)),
                    pl.BlockSpec((C, hidden), lambda b: (0, 0)),   # resident
                    pl.BlockSpec((hidden, C), lambda b: (0, 0)),   # resident
                ],
                out_specs=pl.BlockSpec((bt, C, HW), lambda b: (b, 0, 0)),
            ),
            compiler_params=compiler_params,
            cost_estimate=cost,
        )(x3, w1_t, w2_t)
        return out3.reshape(B, C, H, W)

    # ------------- fallback: spatial (HW) tiling for huge images -------------
    # Pass 1: pooled sum accumulated across HW tiles + excite at the last tile.
    hw_t = _pick_hw_tile(HW, B * C * elt, block_budget)
    n_hw = pl.cdiv(HW, hw_t)
    gate = pl.pallas_call(
        _make_pool_excite_kernel(HW, hw_t),
        out_shape=jax.ShapeDtypeStruct((B, C, 1), jnp.float32),
        grid_spec=pltpu.PrefetchScalarGridSpec(
            num_scalar_prefetch=0,
            grid=(n_hw,),
            in_specs=[
                pl.BlockSpec((B, C, hw_t), lambda hw: (0, 0, hw)),
                pl.BlockSpec((C, hidden), lambda hw: (0, 0)),
                pl.BlockSpec((hidden, C), lambda hw: (0, 0)),
            ],
            out_specs=pl.BlockSpec((B, C, 1), lambda hw: (0, 0, 0)),
            scratch_shapes=[pltpu.VMEM((B, C), jnp.float32)],
        ),
        compiler_params=pltpu.CompilerParams(
            dimension_semantics=("arbitrary",),   # reduction axis
            vmem_limit_bytes=vmem_limit,
        ),
    )(x3, w1_t, w2_t)

    # Pass 2: lane-dense elementwise scale, tiled over (batch, HW).
    out3 = pl.pallas_call(
        _se_scale_kernel,
        out_shape=jax.ShapeDtypeStruct((B, C, HW), x.dtype),
        grid_spec=pltpu.PrefetchScalarGridSpec(
            num_scalar_prefetch=0,
            grid=(B, n_hw),
            in_specs=[
                pl.BlockSpec((1, C, hw_t), lambda b, hw: (b, 0, hw)),
                pl.BlockSpec((1, C, 1), lambda b, hw: (b, 0, 0)),
            ],
            out_specs=pl.BlockSpec((1, C, hw_t), lambda b, hw: (b, 0, hw)),
        ),
        compiler_params=pltpu.CompilerParams(
            dimension_semantics=("parallel", "parallel"),
            vmem_limit_bytes=vmem_limit,
        ),
    )(x3, gate)
    return out3.reshape(B, C, H, W)


def se_layer_ref(x, w1, w2):
    """Pure-JAX reference matching the PyTorch forward."""
    y = jnp.mean(x, axis=(2, 3))                 # AdaptiveAvgPool2d(1)
    y = jnp.maximum(y @ w1.T, 0.0)               # Linear(C, C//r, bias=False) + ReLU
    y = jax.nn.sigmoid(y @ w2.T)                 # Linear(C//r, C, bias=False) + Sigmoid
    return x * y[:, :, None, None]


if __name__ == "__main__":
    B, C, H, W = 4, 64, 16, 16
    reduction = 16
    hidden = C // reduction

    key = jax.random.PRNGKey(0)
    kx, k1, k2 = jax.random.split(key, 3)

    x = jax.random.normal(kx, (B, C, H, W), dtype=jnp.float32)
    # PyTorch Linear weight shapes: (out_features, in_features), bias=False.
    w1 = jax.random.normal(k1, (hidden, C), dtype=jnp.float32) * 0.1
    w2 = jax.random.normal(k2, (C, hidden), dtype=jnp.float32) * 0.1

    ref = jax.block_until_ready(se_layer_ref(x, w1, w2))

    # Fast (fused) path.
    out = jax.block_until_ready(se_layer(x, w1, w2))
    assert out.shape == (B, C, H, W)
    assert jnp.allclose(out, ref, atol=1e-5, rtol=1e-5), "fused path mismatch"

    # Force the spatial-tiling fallback (used when one image exceeds the VMEM
    # budget) to make sure that path also compiles and is numerically correct.
    out_tiled = jax.block_until_ready(
        se_layer(x, w1, w2, max_block_bytes=64 * 1024))
    assert jnp.allclose(out_tiled, ref, atol=1e-5, rtol=1e-5), "tiled path mismatch"

    print("KERNEL_OK")
</pallas_src>

<mosaic_0001>
module attributes {stable_mosaic.version = 11 : i64} {
  func.func @_se_fused_kernel(%arg0: i32, %arg1: memref<4x64x256xf32, #tpu.memory_space<vmem>>, %arg2: memref<64x4xf32, #tpu.memory_space<vmem>>, %arg3: memref<4x64xf32, #tpu.memory_space<vmem>>, %arg4: memref<4x64x256xf32, #tpu.memory_space<vmem>>) attributes {dimension_semantics = [#tpu.dimension_semantics<parallel>], iteration_bounds = array<i64: 1>, scalar_prefetch = 0 : i64, scratch_operands = 0 : i64, tpu.core_type = #tpu.core_type<tc>, window_params = [{transform_indices = @transform_0, window_bounds = array<i64: 4, 64, 256>}, {pipeline_mode = #tpu.pipeline_mode<synchronous>, transform_indices = @transform_1, window_bounds = array<i64: 64, 4>}, {pipeline_mode = #tpu.pipeline_mode<synchronous>, transform_indices = @transform_2, window_bounds = array<i64: 4, 64>}, {transform_indices = @transform_3, window_bounds = array<i64: 4, 64, 256>}]} {
    %c0 = arith.constant 0 : index
    %c0_0 = arith.constant 0 : index
    %c0_1 = arith.constant 0 : index
    %0 = vector.load %arg1[%c0, %c0_0, %c0_1] : memref<4x64x256xf32, #tpu.memory_space<vmem>>, vector<4x64x256xf32>
    %cst = arith.constant dense<0.000000e+00> : vector<4x64xf32>
    %1 = vector.multi_reduction <add>, %0, %cst [2] : vector<4x64x256xf32> to vector<4x64xf32>
    %cst_2 = arith.constant 2.560000e+02 : f32
    %2 = vector.broadcast %cst_2 : f32 to vector<4x64xf32>
    %3 = arith.divf %1, %2 : vector<4x64xf32>
    %c0_3 = arith.constant 0 : index
    %c0_4 = arith.constant 0 : index
    %4 = vector.load %arg2[%c0_3, %c0_4] : memref<64x4xf32, #tpu.memory_space<vmem>>, vector<64x4xf32>
    %cst_5 = arith.constant dense<0.000000e+00> : vector<4x4xf32>
    %5 = tpu.matmul %3, %4, %cst_5 {dimension_numbers = #tpu.dot_dimension_numbers<[1], [0], [0], [1], [0, 0, 1, 1], [], []>} : vector<4x64xf32>, vector<64x4xf32>, vector<4x4xf32> -> vector<4x4xf32>
    %cst_6 = arith.constant 0.000000e+00 : f32
    %6 = vector.broadcast %cst_6 : f32 to vector<4x4xf32>
    %7 = arith.maximumf %5, %6 : vector<4x4xf32>
    %c0_7 = arith.constant 0 : index
    %c0_8 = arith.constant 0 : index
    %8 = vector.load %arg3[%c0_7, %c0_8] : memref<4x64xf32, #tpu.memory_space<vmem>>, vector<4x64xf32>
    %cst_9 = arith.constant dense<0.000000e+00> : vector<4x64xf32>
    %9 = tpu.matmul %7, %8, %cst_9 {dimension_numbers = #tpu.dot_dimension_numbers<[1], [0], [0], [1], [0, 0, 1, 1], [], []>} : vector<4x4xf32>, vector<4x64xf32>, vector<4x64xf32> -> vector<4x64xf32>
    %10 = arith.negf %9 : vector<4x64xf32>
    %11 = math.exp %10 : vector<4x64xf32>
    %cst_10 = arith.constant 1.000000e+00 : f32
    %12 = vector.broadcast %cst_10 : f32 to vector<4x64xf32>
    %13 = arith.addf %12, %11 : vector<4x64xf32>
    %14 = arith.divf %12, %13 : vector<4x64xf32>
    %c0_11 = arith.constant 0 : index
    %c0_12 = arith.constant 0 : index
    %c0_13 = arith.constant 0 : index
    %15 = vector.load %arg1[%c0_11, %c0_12, %c0_13] : memref<4x64x256xf32, #tpu.memory_space<vmem>>, vector<4x64x256xf32>
    %16 = vector.shape_cast %14 : vector<4x64xf32> to vector<4x64x1xf32>
    %17 = vector.broadcast %16 : vector<4x64x1xf32> to vector<4x64x256xf32>
    %18 = arith.mulf %15, %17 : vector<4x64x256xf32>
    %c0_14 = arith.constant 0 : index
    %c0_15 = arith.constant 0 : index
    %c0_16 = arith.constant 0 : index
    %19 = vector.load %arg4[%c0_14, %c0_15, %c0_16] : memref<4x64x256xf32, #tpu.memory_space<vmem>>, vector<4x64x256xf32>
    tpu.vector_store %arg4[%c0_14, %c0_15, %c0_16], %18 {strides = array<i32>} : memref<4x64x256xf32, #tpu.memory_space<vmem>>, vector<4x64x256xf32>,
    return
  }
  func.func @transform_0(%arg0: i32) -> (i32, i32, i32) {
    %c0_i32 = arith.constant 0 : i32
    %c0_i32_0 = arith.constant 0 : i32
    %c0_i32_1 = arith.constant 0 : i32
    return %arg0, %c0_i32, %c0_i32_0 : i32, i32, i32
  }
  func.func @transform_1(%arg0: i32) -> (i32, i32) {
    %c0_i32 = arith.constant 0 : i32
    %c0_i32_0 = arith.constant 0 : i32
    %c0_i32_1 = arith.constant 0 : i32
    return %c0_i32, %c0_i32_0 : i32, i32
  }
  func.func @transform_2(%arg0: i32) -> (i32, i32) {
    %c0_i32 = arith.constant 0 : i32
    %c0_i32_0 = arith.constant 0 : i32
    %c0_i32_1 = arith.constant 0 : i32
    return %c0_i32, %c0_i32_0 : i32, i32
  }
  func.func @transform_3(%arg0: i32) -> (i32, i32, i32) {
    %c0_i32 = arith.constant 0 : i32
    %c0_i32_0 = arith.constant 0 : i32
    %c0_i32_1 = arith.constant 0 : i32
    return %arg0, %c0_i32, %c0_i32_0 : i32, i32, i32
  }
}

</mosaic_0001>

<bundles_post_ra>
// kernel: se_layer.1
= control target key start
LH: loop header
LB: loop body
LE: loop exit
PB: predicated region body
PF: predicated region fallthrough
CT: control target
= control target key end

     0   :  { %vm902_vm0 = vmmov 0   ;;  %vm258_vm1 = vcmask 130112   ;;  %vm265_vm2 = vcmask 195712   ;;  %vm272_vm3 = vcmask 261312   ;;  %s1700_s0 = inlined_call_operand.vmem [shape: f32[4,64,256], index: 0, kind: input, shape index: {}]   ;;  %s1701_s1 = inlined_call_operand.vmem [shape: f32[64,4], index: 1, kind: input, shape index: {}]   ;;  %s1702_s2 = inlined_call_operand.vmem [shape: f32[4,64], index: 2, kind: input, shape index: {}]   ;;  %s1703_s3 = inlined_call_operand.vmem [shape: f32[4,64,256], index: 3, kind: output, shape index: {}]  }
   0x1   :  { %v926_v0 = vld [vmem:[%s1700_s0 + $0x80] sm:$0xff]  ;;  %v931_v1 = vld [vmem:[%s1700_s0 + $0x88] sm:$0xff]  ;;  %v948_v5 = vld [vmem:[%s1700_s0 + $0x90] sm:$0xff]  ;;  %vm279_vm4 = vcmask 326912   ;;  %vm286_vm5 = vcmask 392512   ;;  %vm293_vm6 = vcmask 458112  }
   0x2   :  { %v936_v2 = vld [vmem:[%s1700_s0] sm:$0xff]  ;;  %v102_v3 = vadd.f32 %v931_v1, %v926_v0  ;;  %v943_v4 = vld [vmem:[%s1700_s0 + $0x8] sm:$0xff]  ;;  %1749 = vst [vmem:[#allocation2_spill] sm:$0xff] %v948_v5  ;;  %v953_v6 = vld [vmem:[%s1700_s0 + $0x98] sm:$0xff]  ;;  %vm300_vm7 = vcmask 523712   ;;  %vm419_vm8 = vcmask 1041409  }
   0x3   :  { %1750 = vst [vmem:[#allocation3_spill] sm:$0xff] %v953_v6  ;;  %v78_v7 = vadd.f32 %v943_v4, %v936_v2  ;;  %v960_v8 = vld [vmem:[%s1700_s0 + $0x10] sm:$0xff]  ;;  %v965_v9 = vld [vmem:[%s1700_s0 + $0x18] sm:$0xff]  ;;  %v105_v10 = vadd.f32 %v953_v6, %v948_v5  ;;  %v974_v12 = vld [vmem:[%s1700_s0 + $0xa0] sm:$0xff]  ;;  %vm421_vm9 = vcmask 1042434   ;;  %vm423_vm10 = vcmask 1043459  }
   0x4   :  { %103 = vadd.xlane.f32.xlu1 %v102_v3  ;;  %v81_v11 = vadd.f32 %v965_v9, %v960_v8  ;;  %v979_v13 = vld [vmem:[%s1700_s0 + $0xa8] sm:$0xff]  ;;  %v984_v14 = vld [vmem:[%s1700_s0 + $0x20] sm:$0xff]  ;;  %v998_v18 = vld [vmem:[%s1700_s0 + $0x110] sm:$0xff]  ;;  %vm425_vm11 = vcmask 523264   ;;  %vm504_vm12 = vcmask 1043456   ;;  %vm500_vm13 = vcmask 31744  }
   0x5   :  { %79 = vadd.xlane.f32.xlu0 %v78_v7  ;;  %1751 = vst [vmem:[#allocation4_spill] sm:$0xff] %v979_v13  ;;  %v989_v15 = vld [vmem:[%s1700_s0 + $0x28] sm:$0xff]  ;;  %v108_v16 = vadd.f32 %v979_v13, %v974_v12  ;;  %1752 = vst [vmem:[#allocation5_spill] sm:$0xff] %v998_v18  ;;  %v1003_v19 = vld [vmem:[%s1700_s0 + $0x118] sm:$0xff] }
   0x6   :  { %v84_v17 = vadd.f32 %v989_v15, %v984_v14  ;;  %1753 = vst [vmem:[#allocation6_spill] sm:$0xff] %v1003_v19  ;;  %v1008_v20 = vld [vmem:[%s1700_s0 + $0x100] sm:$0xff]  ;;  %v1013_v21 = vld [vmem:[%s1700_s0 + $0x108] sm:$0xff]  ;;  %v129_v22 = vadd.f32 %v1003_v19, %v998_v18  ;;  %v1022_v24 = vld [vmem:[%s1700_s0 + $0xb0] sm:$0xff] }
   0x7   :  { %1754 = vst [vmem:[#allocation7_spill] sm:$0xff] %v1008_v20  ;;  %1755 = vst [vmem:[#allocation8_spill] sm:$0xff] %v1013_v21  ;;  %v126_v23 = vadd.f32 %v1013_v21, %v1008_v20  ;;  %v1027_v25 = vld [vmem:[%s1700_s0 + $0xb8] sm:$0xff]  ;;  %v1032_v26 = vld [vmem:[%s1700_s0 + $0x30] sm:$0xff] }
   0x8   :  { %106 = vadd.xlane.f32.xlu1 %v105_v10  ;;  %1756 = vst [vmem:[#allocation9_spill] sm:$0xff] %v1022_v24  ;;  %1757 = vst [vmem:[#allocation10_spill] sm:$0xff] %v1027_v25  ;;  %v1037_v27 = vld [vmem:[%s1700_s0 + $0x38] sm:$0xff]  ;;  %v111_v28 = vadd.f32 %v1027_v25, %v1022_v24  ;;  %v1046_v30 = vld [vmem:[%s1700_s0 + $0x180] sm:$0xff] }
   0x9   :  { %82 = vadd.xlane.f32.xlu0 %v81_v11  ;;  %v87_v29 = vadd.f32 %v1037_v27, %v1032_v26  ;;  %1758 = vst [vmem:[#allocation11_spill] sm:$0xff] %v1046_v30  ;;  %v1051_v31 = vld [vmem:[%s1700_s0 + $0x188] sm:$0xff]  ;;  %v1056_v32 = vld [vmem:[%s1700_s0 + $0x120] sm:$0xff]  ;;  %v1080_v38 = vld [vmem:[%s1700_s0 + $0x190] sm:$0xff] }
   0xa   :  { %1759 = vst [vmem:[#allocation12_spill] sm:$0xff] %v1051_v31  ;;  %1760 = vst [vmem:[#allocation13_spill] sm:$0xff] %v1056_v32  ;;  %v1061_v33 = vld [vmem:[%s1700_s0 + $0x128] sm:$0xff]  ;;  %v150_v34 = vadd.f32 %v1051_v31, %v1046_v30  ;;  %v1070_v36 = vld [vmem:[%s1700_s0 + $0x40] sm:$0xff]  ;;  %v247_v30 = vlaneseq }
   0xb   :  { %1761 = vst [vmem:[#allocation14_spill] sm:$0xff] %v1061_v33  ;;  %v132_v35 = vadd.f32 %v1061_v33, %v1056_v32  ;;  %v1075_v37 = vld [vmem:[%s1700_s0 + $0x48] sm:$0xff]  ;;  %1762 = vst [vmem:[#allocation15_spill] sm:$0xff] %v1080_v38  ;;  %v1085_v39 = vld [vmem:[%s1700_s0 + $0x198] sm:$0xff] }
   0xc   :  { %109 = vadd.xlane.f32.xlu1 %v108_v16  ;;  %1763 = vst [vmem:[#allocation16_spill] sm:$0xff] %v1085_v39  ;;  %v90_v40 = vadd.f32 %v1075_v37, %v1070_v36  ;;  %v153_v41 = vadd.f32 %v1085_v39, %v1080_v38  ;;  %v1094_v42 = vld [vmem:[%s1700_s0 + $0x130] sm:$0xff]  ;;  %v1099_v43 = vld [vmem:[%s1700_s0 + $0x138] sm:$0xff]  ;;  %v1104_v44 = vld [vmem:[%s1700_s0 + $0xc0] sm:$0xff] }
   0xd   :  { %85 = vadd.xlane.f32.xlu0 %v84_v17  ;;  %1764 = vst [vmem:[#allocation17_spill] sm:$0xff] %v1094_v42  ;;  %1765 = vst [vmem:[#allocation18_spill] sm:$0xff] %v1099_v43  ;;  %v1109_v45 = vld [vmem:[%s1700_s0 + $0xc8] sm:$0xff]  ;;  %v135_v46 = vadd.f32 %v1099_v43, %v1094_v42  ;;  %v1118_v48 = vld [vmem:[%s1700_s0 + $0x50] sm:$0xff] }
   0xe   :  { %1766 = vst [vmem:[#allocation19_spill] sm:$0xff] %v1104_v44  ;;  %1767 = vst [vmem:[#allocation20_spill] sm:$0xff] %v1109_v45  ;;  %v114_v47 = vadd.f32 %v1109_v45, %v1104_v44  ;;  %v1123_v49 = vld [vmem:[%s1700_s0 + $0x58] sm:$0xff]  ;;  %v1128_v50 = vld [vmem:[%s1700_s0 + $0x1a0] sm:$0xff] }
   0xf   :  { %1768 = vst [vmem:[#allocation21_spill] sm:$0xff] %v1128_v50  ;;  %v1133_v51 = vld [vmem:[%s1700_s0 + $0x1a8] sm:$0xff]  ;;  %v93_v52 = vadd.f32 %v1123_v49, %v1118_v48  ;;  %v1142_v54 = vld [vmem:[%s1700_s0 + $0x140] sm:$0xff]  ;;  %v1152_v56 = vld [vmem:[%s1700_s0 + $0xd0] sm:$0xff] }
  0x10   :  { %130 = vadd.xlane.f32.xlu1 %v129_v22  ;;  %1769 = vst [vmem:[#allocation22_spill] sm:$0xff] %v1133_v51  ;;  %v156_v53 = vadd.f32 %v1133_v51, %v1128_v50  ;;  %1770 = vst [vmem:[#allocation23_spill] sm:$0xff] %v1142_v54  ;;  %v1147_v55 = vld [vmem:[%s1700_s0 + $0x148] sm:$0xff]  ;;  %v1157_v57 = vld [vmem:[%s1700_s0 + $0xd8] sm:$0xff] }
  0x11   :  { %127 = vadd.xlane.f32.xlu0 %v126_v23  ;;  %1771 = vst [vmem:[#allocation24_spill] sm:$0xff] %v1147_v55  ;;  %1772 = vst [vmem:[#allocation25_spill] sm:$0xff] %v1152_v56  ;;  %v138_v58 = vadd.f32 %v1147_v55, %v1142_v54  ;;  %v117_v59 = vadd.f32 %v1157_v57, %v1152_v56  ;;  %v1166_v60 = vld [vmem:[%s1700_s0 + $0x60] sm:$0xff]  ;;  %v1171_v61 = vld [vmem:[%s1700_s0 + $0x68] sm:$0xff] }
  0x12   :  { %1773 = vst [vmem:[#allocation26_spill] sm:$0xff] %v1157_v57  ;;  %v1176_v62 = vld [vmem:[%s1700_s0 + $0x1b0] sm:$0xff]  ;;  %v1181_v63 = vld [vmem:[%s1700_s0 + $0x1b8] sm:$0xff]  ;;  %v96_v3 = vadd.f32 %v1171_v61, %v1166_v60  ;;  %v1200_v16 = vld [vmem:[%s1700_s0 + $0xe0] sm:$0xff] }
  0x13   :  { %1774 = vst [vmem:[#allocation27_spill] sm:$0xff] %v1176_v62  ;;  %1775 = vst [vmem:[#allocation28_spill] sm:$0xff] %v1181_v63  ;;  %v159_v7 = vadd.f32 %v1181_v63, %v1176_v62  ;;  %v1190_v10 = vld [vmem:[%s1700_s0 + $0x150] sm:$0xff]  ;;  %v1195_v11 = vld [vmem:[%s1700_s0 + $0x158] sm:$0xff] }
  0x14   :  { %112 = vadd.xlane.f32.xlu1 %v111_v28  ;;  %1776 = vst [vmem:[#allocation29_spill] sm:$0xff] %v1190_v10  ;;  %1777 = vst [vmem:[#allocation30_spill] sm:$0xff] %v1195_v11  ;;  %v1205_v17 = vld [vmem:[%s1700_s0 + $0xe8] sm:$0xff]  ;;  %v141_v22 = vadd.f32 %v1195_v11, %v1190_v10  ;;  %v1214_v28 = vld [vmem:[%s1700_s0 + $0x70] sm:$0xff] }
  0x15   :  { %88 = vadd.xlane.f32.xlu0 %v87_v29  ;;  %1778 = vst [vmem:[#allocation31_spill] sm:$0xff] %v1200_v16  ;;  %1779 = vst [vmem:[#allocation32_spill] sm:$0xff] %v1205_v17  ;;  %v120_v23 = vadd.f32 %v1205_v17, %v1200_v16  ;;  %v1219_v29 = vld [vmem:[%s1700_s0 + $0x78] sm:$0xff]  ;;  %v1286_v63 = vld [vmem:[%s1700_s0 + $0x1f0] sm:$0xff] }
  0x16   :  { %1790 = vst [vmem:[#allocation43_spill] sm:$0xff] %v1286_v63  ;;  %v1291_v62 = vld [vmem:[%s1700_s0 + $0x1f8] sm:$0xff] }
  0x17   :  { %1791 = vst [vmem:[#allocation44_spill] sm:$0xff] %v1291_v62 }
  0x18   :  { %151 = vadd.xlane.f32.xlu1 %v150_v34  ;;  %v1224_v34 = vld [vmem:[%s1700_s0 + $0x1c0] sm:$0xff] }
  0x19   :  { %133 = vadd.xlane.f32.xlu0 %v132_v35  ;;  %1780 = vst [vmem:[#allocation33_spill] sm:$0xff] %v1224_v34  ;;  %v1229_v35 = vld [vmem:[%s1700_s0 + $0x1c8] sm:$0xff] }
  0x1a   :  { %1781 = vst [vmem:[#allocation34_spill] sm:$0xff] %v1229_v35 }
  0x1c   :  { %91 = vadd.xlane.f32.xlu1 %v90_v40  ;;  %v99_v40 = vadd.f32 %v1219_v29, %v1214_v28 }
  0x1d   :  { %154 = vadd.xlane.f32.xlu0 %v153_v41  ;;  %v162_v41 = vadd.f32 %v1229_v35, %v1224_v34  ;;  %v901_v35 = vmov 0.0   ;;  %v214_v34 = vld [vmem:[%s1701_s1 + $0x38] sm:$0xff] }
  0x1e   :  { %871 = vmatprep.subr.mxu0 %v901_v35  ;;  %890 = vmatprep.subr.mxu1 %v901_v35 }
  0x1f   :  { %872 = vmatpush3.msra.mxu0 %v214_v34  ;;  %v210_v34 = vld [vmem:[%s1701_s1 + $0x18] sm:$0xff]  ;;  %887 = vmatprep.mubr.msk.f32.mxu0 %vm902_vm0, %v901_v35 }
  0x20   :  { %136 = vadd.xlane.f32.xlu1 %v135_v46  ;;  %v1238_v46 = vld [vmem:[%s1700_s0 + $0x160] sm:$0xff]  ;;  %873 = vmatprep.subr.mxu0 %v901_v35 }
  0x21   :  { %115 = vadd.xlane.f32.xlu0 %v114_v47  ;;  %1782 = vst [vmem:[#allocation35_spill] sm:$0xff] %v1238_v46  ;;  %v1243_v47 = vld [vmem:[%s1700_s0 + $0x168] sm:$0xff]  ;;  %892 = vmatprep.mubr.msk.f32.mxu1 %vm902_vm0, %v901_v35 }
  0x22   :  { %1783 = vst [vmem:[#allocation36_spill] sm:$0xff] %v1243_v47 }
  0x24   :  { %94 = vadd.xlane.f32.xlu1 %v93_v52  ;;  %v1248_v52 = vld [vmem:[%s1700_s0 + $0xf0] sm:$0xff] }
  0x25   :  { %157 = vadd.xlane.f32.xlu0 %v156_v53  ;;  %1784 = vst [vmem:[#allocation37_spill] sm:$0xff] %v1248_v52  ;;  %v1253_v53 = vld [vmem:[%s1700_s0 + $0xf8] sm:$0xff] }
  0x26   :  { %1785 = vst [vmem:[#allocation38_spill] sm:$0xff] %v1253_v53 }
  0x28   :  { %139 = vadd.xlane.f32.xlu1 %v138_v58  ;;  %v144_v58 = vadd.f32 %v1243_v47, %v1238_v46  ;;  %v1335_v47 = vshrl.u32 %v247_v30, 7 }
  0x29   :  { %118 = vadd.xlane.f32.xlu0 %v117_v59  ;;  %v123_v59 = vadd.f32 %v1253_v53, %v1248_v52 }
  0x2c   :  { %97 = vadd.xlane.f32.xlu1 %v96_v3  ;;  %v1262_v3 = vld [vmem:[%s1700_s0 + $0x170] sm:$0xff] }
  0x2d   :  { %160 = vadd.xlane.f32.xlu0 %v159_v7  ;;  %1786 = vst [vmem:[#allocation39_spill] sm:$0xff] %v1262_v3  ;;  %v1267_v7 = vld [vmem:[%s1700_s0 + $0x178] sm:$0xff] }
  0x2e   :  { %1787 = vst [vmem:[#allocation40_spill] sm:$0xff] %v1267_v7 }
  0x30   :  { %142 = vadd.xlane.f32.xlu1 %v141_v22  ;;  %v1272_v22 = vld [vmem:[%s1700_s0 + $0x1d0] sm:$0xff] }
  0x31   :  { %121 = vadd.xlane.f32.xlu0 %v120_v23  ;;  %1788 = vst [vmem:[#allocation41_spill] sm:$0xff] %v1272_v22  ;;  %v1277_v23 = vld [vmem:[%s1700_s0 + $0x1d8] sm:$0xff] }
  0x32   :  { %1789 = vst [vmem:[#allocation42_spill] sm:$0xff] %v1277_v23 }
  0x34   :  { %100 = vadd.xlane.f32.xlu1 %v99_v40  ;;  %v147_v40 = vadd.f32 %v1267_v7, %v1262_v3 }
  0x35   :  { %163 = vadd.xlane.f32.xlu0 %v162_v41  ;;  %v165_v41 = vadd.f32 %v1277_v23, %v1272_v22  ;;  %v171_v23 = vadd.f32 %v1291_v62, %v1286_v63 }
  0x38   :  { %145 = vadd.xlane.f32.xlu1 %v144_v58  ;;  %v1296_v58 = vld [vmem:[%s1700_s0 + $0x1e0] sm:$0xff] }
  0x39   :  { %124 = vadd.xlane.f32.xlu0 %v123_v59  ;;  %1792 = vst [vmem:[#allocation45_spill] sm:$0xff] %v1296_v58  ;;  %v1301_v59 = vld [vmem:[%s1700_s0 + $0x1e8] sm:$0xff] }
  0x3a   :  { %1793 = vst [vmem:[#allocation46_spill] sm:$0xff] %v1301_v59  ;;  %v168_v22 = vadd.f32 %v1301_v59, %v1296_v58 }
  0x3c   :  { %148 = vadd.xlane.f32.xlu1 %v147_v40  ;;  %v213_v40 = vld [vmem:[%s1701_s1 + $0x30] sm:$0xff] }
  0x3d   :  { %166 = vadd.xlane.f32.xlu0 %v165_v41  ;;  %874 = vmatpush3.msra.mxu0 %v213_v40  ;;  %v209_v41 = vld [vmem:[%s1701_s1 + $0x10] sm:$0xff]  ;;  %v208_v40 = vld [vmem:[%s1701_s1 + $0x8] sm:$0xff] }
  0x3e   :  { %875 = vmatprep.subr.mxu0 %v901_v35 }
  0x40   :  { %172 = vadd.xlane.f32.xlu1 %v171_v23  ;;  %v212_v23 = vld [vmem:[%s1701_s1 + $0x28] sm:$0xff] }
  0x41   :  { %169 = vadd.xlane.f32.xlu0 %v168_v22  ;;  %876 = vmatpush3.msra.mxu0 %v212_v23  ;;  %v211_v22 = vld [vmem:[%s1701_s1 + $0x20] sm:$0xff] }
  0x42   :  { %877 = vmatprep.subr.mxu0 %v901_v35  ;;  %v207_v23 = vld [vmem:[%s1701_s1] sm:$0xff] }
  0x43   :  { %878 = vmatpush3.msra.mxu0 %v211_v22 }
  0x44   :  { %879 = vmatprep.subr.mxu0 %v901_v35 }
  0x45   :  { %880 = vmatpush3.msra.mxu0 %v210_v34 }
  0x46   :  { %881 = vmatprep.subr.mxu0 %v901_v35 }
  0x47   :  { %882 = vmatpush3.msra.mxu0 %v209_v41 }
  0x48   :  { %883 = vmatprep.subr.mxu0 %v901_v35 }
  0x49   :  { %884 = vmatpush3.msra.mxu0 %v208_v40 }
  0x4a   :  { %885 = vmatprep.subr.mxu0 %v901_v35  ;;  %v248_v35 = vand.u32 127, %v247_v30 }
  0x4b   :  { %886 = vmatpush3.msra.mxu0 %v207_v23 }
  0x4c   :  { %v253_v46 = vadd.s32 4294967288, %v248_v35  ;;  %v260_v43 = vadd.s32 4294967280, %v248_v35  ;;  %v267_v55 = vadd.s32 4294967272, %v248_v35  ;;  %v274_v54 = vadd.s32 4294967264, %v248_v35 }
  0x4d   :  { %v1342_v18 = vsub.s32 %v248_v35, %v1335_v47  ;;  %v281_v30 = vadd.s32 4294967256, %v248_v35  ;;  %v288_v53 = vadd.s32 4294967248, %v248_v35 }
  0x4e   :  { %v1345_v33 = vsub.s32 %v253_v46, %v1335_v47  ;;  %v1348_v32 = vsub.s32 %v260_v43, %v1335_v47  ;;  %v1353_v20 = vsub.s32 %v267_v55, %v1335_v47  ;;  %v1356_v57 = vsub.s32 %v274_v54, %v1335_v47 }
  0x4f   :  { %v1364_v55 = vsub.s32 %v288_v53, %v1335_v47 }
  0x8d   :  { %v104_v22 = vpop.xlane.xlu1 %103 }
  0x8e   :  { %v80_v34 = vpop.xlane.xlu0 %79  ;;  %v183_v46 = vmul.f32 0.00390625, %v104_v22 }
  0x8f   :  { %v175_v44 = vmul.f32 0.00390625, %v80_v34 }
  0x91   :  { %v107_v62 = vpop.xlane.xlu1 %106 }
  0x92   :  { %v83_v63 = vpop.xlane.xlu0 %82  ;;  %v184_v21 = vmul.f32 0.00390625, %v107_v62  ;;  %v1361_v62 = vsub.s32 %v281_v30, %v1335_v47 }
  0x93   :  { %v176_v17 = vmul.f32 0.00390625, %v83_v63 }
  0x94   :  { %v309_v5 = vrot.slane %v184_v21, %v1345_v33  ;;  %v252_v21 = vrot.slane %v175_v44, %v1342_v18 }
  0x95   :  { %v110_v41 = vpop.xlane.xlu1 %109 }
  0x96   :  { %v86_v59 = vpop.xlane.xlu0 %85  ;;  %v185_v16 = vmul.f32 0.00390625, %v110_v41  ;;  %v295_v41 = vadd.s32 4294967240, %v248_v35 }
  0x97   :  { %v177_v43 = vmul.f32 0.00390625, %v86_v59  ;;  %v305_v59 = vrot.slane %v183_v46, %v1342_v18 }
  0x99   :  { %v131_v58 = vpop.xlane.xlu1 %130 }
  0x9a   :  { %v128_v39 = vpop.xlane.xlu0 %127  ;;  %v192_v25 = vmul.f32 0.00390625, %v131_v58  ;;  %v264_v58 = vrot.slane %v177_v43, %v1348_v32 }
  0x9b   :  { %v191_v24 = vmul.f32 0.00390625, %v128_v39  ;;  %v257_v39 = vrot.slane %v176_v17, %v1345_v33  ;;  %v310_v17 = vsel %vm258_vm1, %v309_v5, %v305_v59 }
  0x9c   :  { %v348_v34 = vrot.slane %v192_v25, %v1345_v33 }
  0x9d   :  { %v113_v38 = vpop.xlane.xlu1 %112  ;;  %v344_v53 = vrot.slane %v191_v24, %v1342_v18  ;;  %v259_v24 = vsel %vm258_vm1, %v257_v39, %v252_v21 }
  0x9e   :  { %v89_v51 = vpop.xlane.xlu0 %88  ;;  %v186_v45 = vmul.f32 0.00390625, %v113_v38  ;;  %v314_v38 = vrot.slane %v185_v16, %v1348_v32 }
  0x9f   :  { %v178_v6 = vmul.f32 0.00390625, %v89_v51 }
  0xa0   :  { %v319_v30 = vrot.slane %v186_v45, %v1353_v20  ;;  %v315_v45 = vsel %vm265_vm2, %v314_v38, %v310_v17 }
  0xa1   :  { %v152_v40 = vpop.xlane.xlu1 %151 }
  0xa2   :  { %v134_v50 = vpop.xlane.xlu0 %133  ;;  %v320_v5 = vsel %vm272_vm3, %v319_v30, %v315_v45 }
  0xa3   :  { %v193_v13 = vmul.f32 0.00390625, %v134_v50  ;;  %v271_v50 = vrot.slane %v178_v6, %v1353_v20  ;;  %v1383_v6 = vsub.s32 %v295_v41, %v1335_v47 }
  0xa5   :  { %v92_v7 = vpop.xlane.xlu1 %91  ;;  %v353_v16 = vrot.slane %v193_v13, %v1348_v32 }
  0xa6   :  { %v155_v3 = vpop.xlane.xlu0 %154  ;;  %v179_v22 = vmul.f32 0.00390625, %v92_v7  ;;  %v199_v7 = vmul.f32 0.00390625, %v152_v40  ;;  %v349_v40 = vsel %vm258_vm1, %v348_v34, %v344_v53 }
  0xa7   :  { %v200_v51 = vmul.f32 0.00390625, %v155_v3  ;;  %v354_v41 = vsel %vm265_vm2, %v353_v16, %v349_v40 }
  0xa8   :  { %v278_v3 = vrot.slane %v179_v22, %v1356_v57  ;;  %v383_v22 = vrot.slane %v199_v7, %v1342_v18 }
  0xa9   :  { %v137_v31 = vpop.xlane.xlu1 %136  ;;  %v387_v44 = vrot.slane %v200_v51, %v1345_v33 }
  0xaa   :  { %v116_v11 = vpop.xlane.xlu0 %115  ;;  %v194_v35 = vmul.f32 0.00390625, %v137_v31  ;;  %v266_v31 = vsel %vm265_vm2, %v264_v58, %v259_v24 }
  0xab   :  { %v187_v43 = vmul.f32 0.00390625, %v116_v11  ;;  %v273_v11 = vsel %vm272_vm3, %v271_v50, %v266_v31 }
  0xac   :  { %v358_v59 = vrot.slane %v194_v35, %v1353_v20  ;;  %v280_v38 = vsel %vm279_vm4, %v278_v3, %v273_v11 }
  0xad   :  { %v1331_v10 = vpop.xlane.xlu1 %94  ;;  %v324_v51 = vrot.slane %v187_v43, %v1356_v57 }
  0xae   :  { %v1333_v23 = vpop.xlane.xlu0 %157  ;;  %v180_v13 = vmul.f32 0.00390625, %v1331_v10  ;;  %v388_v10 = vsel %vm258_vm1, %v387_v44, %v383_v22  ;;  %v359_v35 = vsel %vm272_vm3, %v358_v59, %v354_v41 }
  0xaf   :  { %v201_v53 = vmul.f32 0.00390625, %v1333_v23  ;;  %v325_v23 = vsel %vm279_vm4, %v324_v51, %v320_v5 }
  0xb1   :  { %v1337_v42 = vpop.xlane.xlu1 %139 }
  0xb2   :  { %v1339_v19 = vpop.xlane.xlu0 %118  ;;  %v195_v39 = vmul.f32 0.00390625, %v1337_v42  ;;  %v285_v42 = vrot.slane %v180_v13, %v1361_v62 }
  0xb3   :  { %v188_v58 = vmul.f32 0.00390625, %v1339_v19 }
  0xb4   :  { %v363_v19 = vrot.slane %v195_v39, %v1356_v57  ;;  %v287_v40 = vsel %vm286_vm5, %v285_v42, %v280_v38 }
  0xb5   :  { %v1350_v52 = vpop.xlane.xlu1 %97 }
  0xb6   :  { %v1358_v56 = vpop.xlane.xlu0 %160  ;;  %v181_v17 = vmul.f32 0.00390625, %v1350_v52  ;;  %v364_v13 = vsel %vm279_vm4, %v363_v19, %v359_v35 }
  0xb7   :  { %v202_v21 = vmul.f32 0.00390625, %v1358_v56  ;;  %v392_v56 = vrot.slane %v201_v53, %v1348_v32 }
  0xb9   :  { %v143_v54 = vpop.xlane.xlu1 %142  ;;  %v397_v52 = vrot.slane %v202_v21, %v1353_v20  ;;  %v393_v38 = vsel %vm265_vm2, %v392_v56, %v388_v10 }
  0xba   :  { %v122_v63 = vpop.xlane.xlu0 %121  ;;  %v196_v18 = vmul.f32 0.00390625, %v143_v54  ;;  %v329_v54 = vrot.slane %v188_v58, %v1361_v62 }
  0xbb   :  { %v189_v30 = vmul.f32 0.00390625, %v122_v63 }
  0xbc   :  { %v368_v45 = vrot.slane %v196_v18, %v1361_v62  ;;  %v330_v59 = vsel %vm286_vm5, %v329_v54, %v325_v23 }
  0xbd   :  { %v101_v46 = vpop.xlane.xlu1 %100  ;;  %v334_v44 = vrot.slane %v189_v30, %v1364_v55 }
  0xbe   :  { %v164_v25 = vpop.xlane.xlu0 %163  ;;  %v182_v63 = vmul.f32 0.00390625, %v101_v46  ;;  %v292_v46 = vrot.slane %v181_v17, %v1364_v55  ;;  %v369_v51 = vsel %vm286_vm5, %v368_v45, %v364_v13 }
  0xbf   :  { %v203_v16 = vmul.f32 0.00390625, %v164_v25  ;;  %v335_v58 = vsel %vm293_vm6, %v334_v44, %v330_v59  ;;  %v586_v44 = vsub.s32 0, %v1335_v47 }
  0xc0   :  { %v299_v39 = vrot.slane %v182_v63, %v1383_v6  ;;  %v294_v42 = vsel %vm293_vm6, %v292_v46, %v287_v40  ;;  %v691_v46 = vsub.s32 3, %v1335_v47 }
  0xc1   :  { %v146_v33 = vpop.xlane.xlu1 %145  ;;  %v402_v11 = vrot.slane %v203_v16, %v1356_v57  ;;  %v398_v57 = vsel %vm272_vm3, %v397_v52, %v393_v38  ;;  %v621_v52 = vsub.s32 1, %v1335_v47 }
  0xc2   :  { %v125_v34 = vpop.xlane.xlu0 %124  ;;  %v197_v50 = vmul.f32 0.00390625, %v146_v33 }
  0xc3   :  { %v190_v7 = vmul.f32 0.00390625, %v125_v34 }
  0xc4   :  { %v373_v25 = vrot.slane %v197_v50, %v1364_v55  ;;  %v301_v50 = vsel %vm300_vm7, %v299_v39, %v294_v42  ;;  %v1796_v42 = vld [vmem:[#allocation3_spill] sm:$0xff] }
  0xc5   :  { %v149_v3 = vpop.xlane.xlu1 %148  ;;  %v339_v5 = vrot.slane %v190_v7, %v1383_v6 }
  0xc6   :  { %v198_v43 = vmul.f32 0.00390625, %v149_v3  ;;  %v167_v24 = vpop.xlane.xlu0 %166  ;;  %v374_v53 = vsel %vm293_vm6, %v373_v25, %v369_v51 }
  0xc7   :  { %v204_v31 = vmul.f32 0.00390625, %v167_v24  ;;  %v340_v18 = vsel %vm300_vm7, %v339_v5, %v335_v58  ;;  %v656_v5 = vsub.s32 2, %v1335_v47 }
  0xc8   :  { %v378_v32 = vrot.slane %v198_v43, %v1383_v6  ;;  %v420_v19 = vsel %vm419_vm8, %v340_v18, %v301_v50  ;;  %v1798_v50 = vld [vmem:[#allocation20_spill] sm:$0xff] }
  0xc9   :  { %v173_v22 = vpop.xlane.xlu1 %172  ;;  %v407_v33 = vrot.slane %v204_v31, %v1361_v62  ;;  %v403_v62 = vsel %vm279_vm4, %v402_v11, %v398_v57 }
  0xca   :  { %v170_v20 = vpop.xlane.xlu0 %169  ;;  %v206_v41 = vmul.f32 0.00390625, %v173_v22  ;;  %v379_v21 = vsel %vm300_vm7, %v378_v32, %v374_v53  ;;  %v1794_v53 = vld [vmem:[#allocation4_spill] sm:$0xff] }
  0xcb   :  { %v205_v34 = vmul.f32 0.00390625, %v170_v20  ;;  %v408_v7 = vsel %vm286_vm5, %v407_v33, %v403_v62  ;;  %v422_v17 = vsel %vm421_vm9, %v379_v21, %v420_v19  ;;  %v1797_v21 = vld [vmem:[#allocation19_spill] sm:$0xff] }
  0xcc   :  { %v417_v30 = vrot.slane %v206_v41, %v1383_v6 }
  0xcd   :  { %v412_v10 = vrot.slane %v205_v34, %v1364_v55  ;;  %v499_v55 = vld [vmem:[%s1702_s2] sm:$0xf] }
  0xce   :  { %891 = vmatpush3.msk.msra.mxu1 %vm504_vm12, %v499_v55 }
  0xcf   :  { %v413_v35 = vsel %vm293_vm6, %v412_v10, %v408_v7 }
  0xd0   :  { %v418_v6 = vsel %vm300_vm7, %v417_v30, %v413_v35 }
  0xd1   :  { %v424_v16 = vsel %vm423_vm10, %v418_v6, %v422_v17  ;;  %v1799_v6 = vld [vmem:[#allocation9_spill] sm:$0xff] }
  0xd2   :  { %888 = vmatmul.mubr.msk.f32.vlgmr.msra.gmra.mxu0 %vm425_vm11, %v424_v16  ;;  %v1800_v16 = vld [vmem:[#allocation10_spill] sm:$0xff] }
 0x192   :  { %v494_v3 = vpop.f32.mrf.mxu0 }
 0x193   :  { %v498_v23 = vmax.f32 %v494_v3, 0.0  ;;  %v1801_v3 = vld [vmem:[#allocation31_spill] sm:$0xff] }
 0x194   :  { %v889_v54 = vpop.f32.mrf.mxu0 }
 0x195   :  { %893 = vmatmul.mubr.msk.f32.vlgmr.msra.gmra.mxu1 %vm500_vm13, %v498_v23  ;;  %v1802_v54 = vld [vmem:[#allocation32_spill] sm:$0xff] }
 0x255   :  { %v574_v63 = vpop.f32.mrf.mxu1 }
 0x256   :  { %v859_v43 = vmul.f32 -1.442695, %v574_v63 }
 0x257   :  { %v894_v24 = vpop.f32.mrf.mxu1 }
 0x258   :  { %897 = vpow2.f32 %v859_v43 }
 0x265   :  { %v898_v56 = vpop.eup %897 }
 0x266   :  { %v581_v45 = vadd.f32 1.0, %v898_v56  ;;  %v1803_v56 = vld [vmem:[#allocation25_spill] sm:$0xff] }
 0x268   :  { %899 = vrcp.f32 %v581_v45 }
 0x275   :  { %v900_v31 = vpop.eup %899 }
 0x276   :  { %v587_v40 = vrot.slane %v900_v31, %v586_v44  ;;  %v622_v25 = vrot.slane %v900_v31, %v621_v52  ;;  %v657_v13 = vrot.slane %v900_v31, %v656_v5  ;;  %v692_v11 = vrot.slane %v900_v31, %v691_v46  ;;  %v1804_v44 = vld [vmem:[#allocation26_spill] sm:$0xff] }
 0x278   :  { %593 = vbcast.lane.b32.xlu1 %v587_v40, 264  ;;  %589 = vbcast.lane.b32.xlu0 %v587_v40, 256 }
 0x27c   :  { %597 = vbcast.lane.b32.xlu1 %v587_v40, 272  ;;  %605 = vbcast.lane.b32.xlu0 %v587_v40, 288 }
 0x280   :  { %601 = vbcast.lane.b32.xlu1 %v587_v40, 280  ;;  %613 = vbcast.lane.b32.xlu0 %v587_v40, 304 }
 0x284   :  { %609 = vbcast.lane.b32.xlu1 %v587_v40, 296  ;;  %624 = vbcast.lane.b32.xlu0 %v622_v25, 256 }
 0x288   :  { %617 = vbcast.lane.b32.xlu1 %v587_v40, 312  ;;  %632 = vbcast.lane.b32.xlu0 %v622_v25, 272  ;;  %v1805_v40 = vld [vmem:[#allocation7_spill] sm:$0xff] }
 0x28c   :  { %628 = vbcast.lane.b32.xlu1 %v622_v25, 264  ;;  %640 = vbcast.lane.b32.xlu0 %v622_v25, 288 }
 0x290   :  { %636 = vbcast.lane.b32.xlu1 %v622_v25, 280  ;;  %648 = vbcast.lane.b32.xlu0 %v622_v25, 304 }
 0x294   :  { %644 = vbcast.lane.b32.xlu1 %v622_v25, 296  ;;  %659 = vbcast.lane.b32.xlu0 %v657_v13, 256 }
 0x298   :  { %652 = vbcast.lane.b32.xlu1 %v622_v25, 312  ;;  %667 = vbcast.lane.b32.xlu0 %v657_v13, 272  ;;  %v1806_v25 = vld [vmem:[#allocation8_spill] sm:$0xff] }
 0x29c   :  { %663 = vbcast.lane.b32.xlu1 %v657_v13, 264  ;;  %675 = vbcast.lane.b32.xlu0 %v657_v13, 288 }
 0x2a0   :  { %671 = vbcast.lane.b32.xlu1 %v657_v13, 280  ;;  %683 = vbcast.lane.b32.xlu0 %v657_v13, 304 }
 0x2a4   :  { %679 = vbcast.lane.b32.xlu1 %v657_v13, 296  ;;  %694 = vbcast.lane.b32.xlu0 %v692_v11, 256 }
 0x2a8   :  { %687 = vbcast.lane.b32.xlu1 %v657_v13, 312  ;;  %702 = vbcast.lane.b32.xlu0 %v692_v11, 272 }
 0x2ac   :  { %698 = vbcast.lane.b32.xlu1 %v692_v11, 264  ;;  %710 = vbcast.lane.b32.xlu0 %v692_v11, 288 }
 0x2b0   :  { %706 = vbcast.lane.b32.xlu1 %v692_v11, 280  ;;  %718 = vbcast.lane.b32.xlu0 %v692_v11, 304 }
 0x2b4   :  { %714 = vbcast.lane.b32.xlu1 %v692_v11, 296 }
 0x2b8   :  { %722 = vbcast.lane.b32.xlu1 %v692_v11, 312  ;;  %v1807_v11 = vld [vmem:[#allocation37_spill] sm:$0xff] }
 0x2ea   :  { %v594_v32 = vpop.permute.xlu1 %593  ;;  %v590_v22 = vpop.permute.xlu0 %589 }
 0x2eb   :  { %v726_v59 = vmul.f32 %v594_v32, %v960_v8  ;;  %v727_v39 = vmul.f32 %v594_v32, %v965_v9  ;;  %v724_v47 = vmul.f32 %v590_v22, %v936_v2  ;;  %v725_v33 = vmul.f32 %v590_v22, %v943_v4  ;;  %v1808_v22 = vld [vmem:[#allocation38_spill] sm:$0xff] }
 0x2ed   :  { %790 = vst [vmem:[%s1703_s3 + $0x10] sm:$0xff] %v726_v59  ;;  %791 = vst [vmem:[%s1703_s3 + $0x18] sm:$0xff] %v727_v39  ;;  %v1809_v39 = vld [vmem:[#allocation13_spill] sm:$0xff] }
 0x2ee   :  { %788 = vst [vmem:[%s1703_s3] sm:$0xff] %v724_v47  ;;  %789 = vst [vmem:[%s1703_s3 + $0x8] sm:$0xff] %v725_v33  ;;  %v598_v8 = vpop.permute.xlu1 %597  ;;  %v606_v2 = vpop.permute.xlu0 %605  ;;  %v1810_v33 = vld [vmem:[#allocation14_spill] sm:$0xff] }
 0x2ef   :  { %v728_v4 = vmul.f32 %v598_v8, %v984_v14  ;;  %v729_v9 = vmul.f32 %v598_v8, %v989_v15  ;;  %v732_v20 = vmul.f32 %v606_v2, %v1070_v36  ;;  %v733_v41 = vmul.f32 %v606_v2, %v1075_v37 }
 0x2f1   :  { %792 = vst [vmem:[%s1703_s3 + $0x20] sm:$0xff] %v728_v4  ;;  %793 = vst [vmem:[%s1703_s3 + $0x28] sm:$0xff] %v729_v9  ;;  %v1811_v9 = vld [vmem:[#allocation5_spill] sm:$0xff] }
 0x2f2   :  { %796 = vst [vmem:[%s1703_s3 + $0x40] sm:$0xff] %v732_v20  ;;  %797 = vst [vmem:[%s1703_s3 + $0x48] sm:$0xff] %v733_v41  ;;  %v602_v14 = vpop.permute.xlu1 %601  ;;  %v614_v15 = vpop.permute.xlu0 %613  ;;  %v1812_v41 = vld [vmem:[#allocation6_spill] sm:$0xff] }
 0x2f3   :  { %v730_v36 = vmul.f32 %v602_v14, %v1032_v26  ;;  %v731_v37 = vmul.f32 %v602_v14, %v1037_v27  ;;  %v736_v38 = vmul.f32 %v614_v15, %v1166_v60  ;;  %v737_v51 = vmul.f32 %v614_v15, %v1171_v61  ;;  %v1813_v15 = vld [vmem:[#allocation23_spill] sm:$0xff] }
 0x2f5   :  { %794 = vst [vmem:[%s1703_s3 + $0x30] sm:$0xff] %v730_v36  ;;  %795 = vst [vmem:[%s1703_s3 + $0x38] sm:$0xff] %v731_v37  ;;  %v1814_v37 = vld [vmem:[#allocation24_spill] sm:$0xff] }
 0x2f6   :  { %800 = vst [vmem:[%s1703_s3 + $0x60] sm:$0xff] %v736_v38  ;;  %801 = vst [vmem:[%s1703_s3 + $0x68] sm:$0xff] %v737_v51  ;;  %v610_v26 = vpop.permute.xlu1 %609  ;;  %v625_v27 = vpop.permute.xlu0 %624 }
 0x2f7   :  { %v734_v60 = vmul.f32 %v610_v26, %v1118_v48  ;;  %v735_v61 = vmul.f32 %v610_v26, %v1123_v49  ;;  %v740_v58 = vmul.f32 %v625_v27, %v926_v0  ;;  %v741_v34 = vmul.f32 %v625_v27, %v931_v1  ;;  %v1815_v27 = vld [vmem:[#allocation17_spill] sm:$0xff] }
 0x2f9   :  { %798 = vst [vmem:[%s1703_s3 + $0x50] sm:$0xff] %v734_v60  ;;  %799 = vst [vmem:[%s1703_s3 + $0x58] sm:$0xff] %v735_v61  ;;  %v1816_v61 = vld [vmem:[#allocation18_spill] sm:$0xff] }
 0x2fa   :  { %804 = vst [vmem:[%s1703_s3 + $0x80] sm:$0xff] %v740_v58  ;;  %805 = vst [vmem:[%s1703_s3 + $0x88] sm:$0xff] %v741_v34  ;;  %v618_v48 = vpop.permute.xlu1 %617  ;;  %v633_v0 = vpop.permute.xlu0 %632  ;;  %v1817_v34 = vld [vmem:[#allocation35_spill] sm:$0xff] }
 0x2fb   :  { %v738_v1 = vmul.f32 %v618_v48, %v1214_v28  ;;  %v739_v49 = vmul.f32 %v618_v48, %v1219_v29  ;;  %v744_v57 = vmul.f32 %v633_v0, %v974_v12  ;;  %v745_v18 = vmul.f32 %v633_v0, %v1794_v53  ;;  %v1795_v29 = vld [vmem:[#allocation2_spill] sm:$0xff]  ;;  %v1818_v0 = vld [vmem:[#allocation36_spill] sm:$0xff]  ;;  %v1819_v53 = vld [vmem:[#allocation29_spill] sm:$0xff] }
 0x2fd   :  { %802 = vst [vmem:[%s1703_s3 + $0x70] sm:$0xff] %v738_v1  ;;  %803 = vst [vmem:[%s1703_s3 + $0x78] sm:$0xff] %v739_v49 }
 0x2fe   :  { %808 = vst [vmem:[%s1703_s3 + $0xa0] sm:$0xff] %v744_v57  ;;  %809 = vst [vmem:[%s1703_s3 + $0xa8] sm:$0xff] %v745_v18  ;;  %v629_v28 = vpop.permute.xlu1 %628  ;;  %v641_v12 = vpop.permute.xlu0 %640 }
 0x2ff   :  { %v742_v30 = vmul.f32 %v629_v28, %v1795_v29  ;;  %v743_v62 = vmul.f32 %v629_v28, %v1796_v42  ;;  %v748_v10 = vmul.f32 %v641_v12, %v1797_v21  ;;  %v749_v7 = vmul.f32 %v641_v12, %v1798_v50  ;;  %v1820_v28 = vld [vmem:[#allocation30_spill] sm:$0xff]  ;;  %v1821_v29 = vld [vmem:[#allocation11_spill] sm:$0xff]  ;;  %v1822_v42 = vld [vmem:[#allocation12_spill] sm:$0xff] }
 0x300   :  { %v1823_v50 = vld [vmem:[#allocation39_spill] sm:$0xff] }
 0x301   :  { %806 = vst [vmem:[%s1703_s3 + $0x90] sm:$0xff] %v742_v30  ;;  %807 = vst [vmem:[%s1703_s3 + $0x98] sm:$0xff] %v743_v62 }
 0x302   :  { %812 = vst [vmem:[%s1703_s3 + $0xc0] sm:$0xff] %v748_v10  ;;  %813 = vst [vmem:[%s1703_s3 + $0xc8] sm:$0xff] %v749_v7  ;;  %v637_v35 = vpop.permute.xlu1 %636  ;;  %v649_v19 = vpop.permute.xlu0 %648 }
 0x303   :  { %v746_v17 = vmul.f32 %v637_v35, %v1799_v6  ;;  %v747_v55 = vmul.f32 %v637_v35, %v1800_v16  ;;  %v752_v23 = vmul.f32 %v649_v19, %v1801_v3  ;;  %v753_v63 = vmul.f32 %v649_v19, %v1802_v54  ;;  %v1824_v35 = vld [vmem:[#allocation40_spill] sm:$0xff]  ;;  %v1825_v6 = vld [vmem:[#allocation21_spill] sm:$0xff]  ;;  %v1826_v16 = vld [vmem:[#allocation22_spill] sm:$0xff] }
 0x304   :  { %v1827_v54 = vld [vmem:[#allocation15_spill] sm:$0xff] }
 0x305   :  { %810 = vst [vmem:[%s1703_s3 + $0xb0] sm:$0xff] %v746_v17  ;;  %811 = vst [vmem:[%s1703_s3 + $0xb8] sm:$0xff] %v747_v55 }
 0x306   :  { %816 = vst [vmem:[%s1703_s3 + $0xe0] sm:$0xff] %v752_v23  ;;  %817 = vst [vmem:[%s1703_s3 + $0xe8] sm:$0xff] %v753_v63  ;;  %v645_v43 = vpop.permute.xlu1 %644  ;;  %v660_v24 = vpop.permute.xlu0 %659 }
 0x307   :  { %v750_v45 = vmul.f32 %v645_v43, %v1803_v56  ;;  %v751_v31 = vmul.f32 %v645_v43, %v1804_v44  ;;  %v756_v52 = vmul.f32 %v660_v24, %v1805_v40  ;;  %v757_v5 = vmul.f32 %v660_v24, %v1806_v25  ;;  %v1828_v43 = vld [vmem:[#allocation16_spill] sm:$0xff]  ;;  %v1829_v56 = vld [vmem:[#allocation33_spill] sm:$0xff]  ;;  %v1830_v44 = vld [vmem:[#allocation34_spill] sm:$0xff] }
 0x308   :  { %v1831_v25 = vld [vmem:[#allocation27_spill] sm:$0xff] }
 0x309   :  { %814 = vst [vmem:[%s1703_s3 + $0xd0] sm:$0xff] %v750_v45  ;;  %815 = vst [vmem:[%s1703_s3 + $0xd8] sm:$0xff] %v751_v31 }
 0x30a   :  { %820 = vst [vmem:[%s1703_s3 + $0x100] sm:$0xff] %v756_v52  ;;  %821 = vst [vmem:[%s1703_s3 + $0x108] sm:$0xff] %v757_v5  ;;  %v653_v13 = vpop.permute.xlu1 %652  ;;  %v668_v46 = vpop.permute.xlu0 %667 }
 0x30b   :  { %v754_v32 = vmul.f32 %v653_v13, %v1807_v11  ;;  %v755_v59 = vmul.f32 %v653_v13, %v1808_v22  ;;  %v760_v47 = vmul.f32 %v668_v46, %v1809_v39  ;;  %v761_v8 = vmul.f32 %v668_v46, %v1810_v33  ;;  %v1832_v13 = vld [vmem:[#allocation28_spill] sm:$0xff]  ;;  %v1833_v11 = vld [vmem:[#allocation45_spill] sm:$0xff]  ;;  %v1834_v22 = vld [vmem:[#allocation46_spill] sm:$0xff] }
 0x30d   :  { %818 = vst [vmem:[%s1703_s3 + $0xf0] sm:$0xff] %v754_v32  ;;  %819 = vst [vmem:[%s1703_s3 + $0xf8] sm:$0xff] %v755_v59 }
 0x30e   :  { %824 = vst [vmem:[%s1703_s3 + $0x120] sm:$0xff] %v760_v47  ;;  %825 = vst [vmem:[%s1703_s3 + $0x128] sm:$0xff] %v761_v8  ;;  %v664_v2 = vpop.permute.xlu1 %663  ;;  %v676_v4 = vpop.permute.xlu0 %675  ;;  %v1835_v47 = vld [vmem:[#allocation41_spill] sm:$0xff]  ;;  %v1836_v8 = vld [vmem:[#allocation42_spill] sm:$0xff] }
 0x30f   :  { %v758_v20 = vmul.f32 %v664_v2, %v1811_v9  ;;  %v759_v14 = vmul.f32 %v664_v2, %v1812_v41  ;;  %v764_v36 = vmul.f32 %v676_v4, %v1813_v15  ;;  %v765_v38 = vmul.f32 %v676_v4, %v1814_v37  ;;  %v1837_v9 = vld [vmem:[#allocation43_spill] sm:$0xff]  ;;  %v1838_v41 = vld [vmem:[#allocation44_spill] sm:$0xff] }
 0x311   :  { %822 = vst [vmem:[%s1703_s3 + $0x110] sm:$0xff] %v758_v20  ;;  %823 = vst [vmem:[%s1703_s3 + $0x118] sm:$0xff] %v759_v14 }
 0x312   :  { %828 = vst [vmem:[%s1703_s3 + $0x140] sm:$0xff] %v764_v36  ;;  %829 = vst [vmem:[%s1703_s3 + $0x148] sm:$0xff] %v765_v38  ;;  %v672_v51 = vpop.permute.xlu1 %671  ;;  %v684_v26 = vpop.permute.xlu0 %683 }
 0x313   :  { %v762_v60 = vmul.f32 %v672_v51, %v1815_v27  ;;  %v763_v58 = vmul.f32 %v672_v51, %v1816_v61  ;;  %v768_v48 = vmul.f32 %v684_v26, %v1817_v34  ;;  %v769_v1 = vmul.f32 %v684_v26, %v1818_v0 }
 0x315   :  { %826 = vst [vmem:[%s1703_s3 + $0x130] sm:$0xff] %v762_v60  ;;  %827 = vst [vmem:[%s1703_s3 + $0x138] sm:$0xff] %v763_v58 }
 0x316   :  { %832 = vst [vmem:[%s1703_s3 + $0x160] sm:$0xff] %v768_v48  ;;  %833 = vst [vmem:[%s1703_s3 + $0x168] sm:$0xff] %v769_v1  ;;  %v680_v49 = vpop.permute.xlu1 %679  ;;  %v695_v57 = vpop.permute.xlu0 %694 }
 0x317   :  { %v766_v18 = vmul.f32 %v680_v49, %v1819_v53  ;;  %v767_v12 = vmul.f32 %v680_v49, %v1820_v28  ;;  %v772_v30 = vmul.f32 %v695_v57, %v1821_v29  ;;  %v773_v62 = vmul.f32 %v695_v57, %v1822_v42 }
 0x319   :  { %830 = vst [vmem:[%s1703_s3 + $0x150] sm:$0xff] %v766_v18  ;;  %831 = vst [vmem:[%s1703_s3 + $0x158] sm:$0xff] %v767_v12 }
 0x31a   :  { %836 = vst [vmem:[%s1703_s3 + $0x180] sm:$0xff] %v772_v30  ;;  %837 = vst [vmem:[%s1703_s3 + $0x188] sm:$0xff] %v773_v62  ;;  %v688_v21 = vpop.permute.xlu1 %687  ;;  %v703_v10 = vpop.permute.xlu0 %702 }
 0x31b   :  { %v770_v7 = vmul.f32 %v688_v21, %v1823_v50  ;;  %v771_v19 = vmul.f32 %v688_v21, %v1824_v35  ;;  %v776_v17 = vmul.f32 %v703_v10, %v1825_v6  ;;  %v777_v55 = vmul.f32 %v703_v10, %v1826_v16 }
 0x31d   :  { %834 = vst [vmem:[%s1703_s3 + $0x170] sm:$0xff] %v770_v7  ;;  %835 = vst [vmem:[%s1703_s3 + $0x178] sm:$0xff] %v771_v19 }
 0x31e   :  { %840 = vst [vmem:[%s1703_s3 + $0x1a0] sm:$0xff] %v776_v17  ;;  %841 = vst [vmem:[%s1703_s3 + $0x1a8] sm:$0xff] %v777_v55  ;;  %v699_v3 = vpop.permute.xlu1 %698  ;;  %v711_v23 = vpop.permute.xlu0 %710 }
 0x31f   :  { %v774_v63 = vmul.f32 %v699_v3, %v1827_v54  ;;  %v775_v24 = vmul.f32 %v699_v3, %v1828_v43  ;;  %v780_v45 = vmul.f32 %v711_v23, %v1829_v56  ;;  %v781_v31 = vmul.f32 %v711_v23, %v1830_v44 }
 0x321   :  { %838 = vst [vmem:[%s1703_s3 + $0x190] sm:$0xff] %v774_v63  ;;  %839 = vst [vmem:[%s1703_s3 + $0x198] sm:$0xff] %v775_v24 }
 0x322   :  { %844 = vst [vmem:[%s1703_s3 + $0x1c0] sm:$0xff] %v780_v45  ;;  %845 = vst [vmem:[%s1703_s3 + $0x1c8] sm:$0xff] %v781_v31  ;;  %v707_v40 = vpop.permute.xlu1 %706  ;;  %v719_v52 = vpop.permute.xlu0 %718 }
 0x323   :  { %v778_v5 = vmul.f32 %v707_v40, %v1831_v25  ;;  %v779_v46 = vmul.f32 %v707_v40, %v1832_v13  ;;  %v784_v32 = vmul.f32 %v719_v52, %v1833_v11  ;;  %v785_v59 = vmul.f32 %v719_v52, %v1834_v22 }
 0x325   :  { %842 = vst [vmem:[%s1703_s3 + $0x1b0] sm:$0xff] %v778_v5  ;;  %843 = vst [vmem:[%s1703_s3 + $0x1b8] sm:$0xff] %v779_v46 }
 0x326   :  { %848 = vst [vmem:[%s1703_s3 + $0x1e0] sm:$0xff] %v784_v32  ;;  %849 = vst [vmem:[%s1703_s3 + $0x1e8] sm:$0xff] %v785_v59  ;;  %v715_v39 = vpop.permute.xlu1 %714 }
 0x327   :  { %v782_v33 = vmul.f32 %v715_v39, %v1835_v47  ;;  %v783_v2 = vmul.f32 %v715_v39, %v1836_v8 }
 0x329   :  { %846 = vst [vmem:[%s1703_s3 + $0x1d0] sm:$0xff] %v782_v33  ;;  %847 = vst [vmem:[%s1703_s3 + $0x1d8] sm:$0xff] %v783_v2 }
 0x32a   :  { %v723_v4 = vpop.permute.xlu1 %722 }
 0x32b   :  { %v786_v20 = vmul.f32 %v723_v4, %v1837_v9  ;;  %v787_v14 = vmul.f32 %v723_v4, %v1838_v41 }
 0x32d   :  { %850 = vst [vmem:[%s1703_s3 + $0x1f0] sm:$0xff] %v786_v20  ;;  %851 = vst [vmem:[%s1703_s3 + $0x1f8] sm:$0xff] %v787_v14 }

</bundles_post_ra>
